<compile_context>
chip_gen: v7x
topology: tpu7x:2x2x1
jax: 0.10.0
libtpu: 0.0.40
codegen_flags: <defaults>
</compile_context>

<pallas_src>
import functools

import jax
import jax.numpy as jnp
from jax import lax
from jax.experimental import pallas as pl
from jax.experimental.pallas import tpu as pltpu


def _round_up(n, m):
    return -(-n // m) * m


def _convlstm_kernel(patch_ref, w_ref, c_ref, h_out_ref, c_out_ref):
    """One (batch, pixel-tile) grid step.

    patch_ref : (K_pad, T)   im2col patch + ones-row (bias), lanes = pixels
    w_ref     : (4*hid, K_pad) flattened conv weight with bias column (resident)
    c_ref     : (hid, T)     previous cell state for this pixel tile
    h_out_ref : (hid, T)
    c_out_ref : (hid, T)
    """
    hid = c_ref.shape[0]

    # Whole conv (+bias) for this tile as ONE MXU matmul, f32 accumulation.
    acc = jnp.dot(w_ref[...], patch_ref[...],
                  preferred_element_type=jnp.float32)      # (4*hid, T)

    # Gate order matches torch.chunk(conv_out, 4, dim=1): i, f, o, g.
    # sigmoid(x) = 0.5 * tanh(0.5*x) + 0.5  -> one EUP push per element
    # (instead of exp + reciprocal), fused over the stacked i/f/o rows.
    ifo = 0.5 * jnp.tanh(0.5 * acc[: 3 * hid, :]) + 0.5
    g_g = jnp.tanh(acc[3 * hid:, :])
    i_g = ifo[:hid]
    f_g = ifo[hid:2 * hid]
    o_g = ifo[2 * hid:]

    c_prev = c_ref[...].astype(jnp.float32)
    c_next = f_g * c_prev + i_g * g_g
    h_next = o_g * jnp.tanh(c_next)

    # Lane-dense, unmasked stores (tile width is a multiple of 128).
    h_out_ref[...] = h_next.astype(h_out_ref.dtype)
    c_out_ref[...] = c_next.astype(c_out_ref.dtype)


def conv_lstm2d_cell(x, h_prev, c_prev, weight, bias, padding,
                     *, pix_tile=512, compute_dtype=jnp.bfloat16):
    """ConvLSTM2D cell forward.

    x      : (B, Cin, H, W)           NCHW, like the PyTorch module
    h_prev : (B, hid, H, W)
    c_prev : (B, hid, H, W)
    weight : (4*hid, Cin+hid, KH, KW) PyTorch OIHW conv weight
    bias   : (4*hid,)
    returns (h_next, c_next), both (B, hid, H, W)

    compute_dtype: dtype of the MXU operands (patches / weights).  Gate math
    and accumulation are always f32.  Use jnp.float32 for strictest fidelity.
    """
    B, Cin, H, W = x.shape
    hid = h_prev.shape[1]
    four_hid, C, KH, KW = weight.shape
    assert four_hid == 4 * hid and C == Cin + hid
    p = padding
    # The module's elementwise math requires a "same"-size conv output.
    assert KH == 2 * p + 1 and KW == 2 * p + 1, (
        "ConvLSTM2DCell requires kernel_size == 2*padding + 1")

    npix = H * W

    # ---- pixel-tile choice: big lane-dense tiles, small grid ----
    tile = max(128, min(_round_up(pix_tile, 128), _round_up(npix, 128)))
    # Keep at least 2 grid steps when possible (two v7x TensorCores).
    if B * (_round_up(npix, tile) // tile) < 2 and npix > 128:
        tile = _round_up((npix + 1) // 2, 128)
    P = _round_up(npix, tile)       # padded pixel count (lane axis)
    nT = P // tile
    npad = P - npix

    K = KH * KW * C
    Kb = K + 1                      # +1 ones-row that carries the bias
    K_pad = _round_up(Kb, 16)       # sublane-friendly contraction length

    # ---- wrapper glue (plain JAX / XLA): concat, pad, im2col, bias fold ----
    combined = jnp.concatenate([x, h_prev], axis=1)                   # (B,C,H,W)
    padded = jnp.pad(combined, ((0, 0), (0, 0), (p, p), (p, p)))
    # im2col: row index = (kh*KW + kw)*C + c  (matches the weight flattening).
    shifted = [padded[:, :, kh:kh + H, kw:kw + W]
               for kh in range(KH) for kw in range(KW)]
    patches = jnp.concatenate(shifted, axis=1).reshape(B, K, npix)
    ones = jnp.ones((B, 1, npix), patches.dtype)                      # bias row
    patches = jnp.concatenate([patches, ones], axis=1)                # (B,Kb,npix)
    patches = jnp.pad(patches, ((0, 0), (0, K_pad - Kb), (0, npad)))
    patches = patches.astype(compute_dtype)                           # (B,K_pad,P)

    w2d = weight.transpose(0, 2, 3, 1).reshape(four_hid, K)           # (4h,K)
    w2d = jnp.concatenate([w2d, bias.reshape(four_hid, 1)], axis=1)   # bias col
    w2d = jnp.pad(w2d, ((0, 0), (0, K_pad - Kb))).astype(compute_dtype)

    c_flat = c_prev.reshape(B, hid, npix)
    c_flat = jnp.pad(c_flat, ((0, 0), (0, 0), (0, npad)))             # (B,hid,P)

    out_shape = (
        jax.ShapeDtypeStruct((B, hid, P), x.dtype),
        jax.ShapeDtypeStruct((B, hid, P), x.dtype),
    )

    grid_spec = pltpu.PrefetchScalarGridSpec(
        num_scalar_prefetch=0,
        grid=(B, nT),
        in_specs=[
            pl.BlockSpec((None, K_pad, tile), lambda b, t: (b, 0, t)),
            pl.BlockSpec((four_hid, K_pad), lambda b, t: (0, 0)),     # resident
            pl.BlockSpec((None, hid, tile), lambda b, t: (b, 0, t)),
        ],
        out_specs=[
            pl.BlockSpec((None, hid, tile), lambda b, t: (b, 0, t)),
            pl.BlockSpec((None, hid, tile), lambda b, t: (b, 0, t)),
        ],
    )

    h_pk, c_pk = pl.pallas_call(
        _convlstm_kernel,
        out_shape=out_shape,
        grid_spec=grid_spec,
        input_output_aliases={2: 1},        # c_prev buffer -> c_next (in place)
        compiler_params=pltpu.CompilerParams(
            dimension_semantics=("parallel", "parallel"),
            vmem_limit_bytes=32 * 1024 * 1024),
    )(patches, w2d, c_flat)

    # Padded pixel lanes hold garbage; slice them off before reshaping.
    def unpack(a):
        return a[:, :, :npix].reshape(B, hid, H, W)

    return unpack(h_pk), unpack(c_pk)


def _reference_cell(x, h_prev, c_prev, weight, bias, padding):
    """Pure-JAX reference mirroring the PyTorch module (NCHW, f32)."""
    p = padding
    combined = jnp.concatenate([x, h_prev], axis=1)
    conv = lax.conv_general_dilated(
        combined, weight, window_strides=(1, 1),
        padding=[(p, p), (p, p)],
        dimension_numbers=("NCHW", "OIHW", "NCHW"),
    ) + bias[None, :, None, None]
    cc_i, cc_f, cc_o, cc_g = jnp.split(conv, 4, axis=1)
    i = jax.nn.sigmoid(cc_i)
    f = jax.nn.sigmoid(cc_f)
    o = jax.nn.sigmoid(cc_o)
    g = jnp.tanh(cc_g)
    c_next = f * c_prev + i * g
    h_next = o * jnp.tanh(c_next)
    return h_next, c_next


if __name__ == "__main__":
    # Module hyperparameters (small, consistent with the forward pass).
    input_dim, hidden_dim = 4, 8
    kernel_size, padding = 3, 1
    B, H, W = 2, 16, 16

    key = jax.random.PRNGKey(0)
    kx, kh, kc, kw, kb = jax.random.split(key, 5)

    x = jax.random.normal(kx, (B, input_dim, H, W), dtype=jnp.float32)
    h_prev = jax.random.normal(kh, (B, hidden_dim, H, W), dtype=jnp.float32)
    c_prev = jax.random.normal(kc, (B, hidden_dim, H, W), dtype=jnp.float32)

    # Deterministic synthetic parameters (nn.Conv2d-shaped).
    C = input_dim + hidden_dim
    fan_in = C * kernel_size * kernel_size
    bound = 1.0 / (fan_in ** 0.5)
    weight = jax.random.uniform(
        kw, (4 * hidden_dim, C, kernel_size, kernel_size),
        minval=-bound, maxval=bound, dtype=jnp.float32)
    bias = jax.random.uniform(
        kb, (4 * hidden_dim,), minval=-bound, maxval=bound, dtype=jnp.float32)

    cell = jax.jit(functools.partial(conv_lstm2d_cell, padding=padding))
    h_next, c_next = cell(x, h_prev, c_prev, weight, bias)
    jax.block_until_ready((h_next, c_next))

    # Correctness check vs plain-JAX f32 reference of the PyTorch forward.
    # Kernel uses bf16 MXU operands with f32 accumulation / f32 gate math, so
    # the expected deviation is O(1e-3); tolerance is sized accordingly.
    h_ref, c_ref = _reference_cell(x, h_prev, c_prev, weight, bias, padding)
    assert jnp.allclose(h_next, h_ref, atol=2e-2, rtol=2e-2)
    assert jnp.allclose(c_next, c_ref, atol=2e-2, rtol=2e-2)

    print("KERNEL_OK")
</pallas_src>

<mosaic_0001>
module attributes {stable_mosaic.version = 11 : i64} {
  func.func @_convlstm_kernel(%arg0: i32, %arg1: i32, %arg2: memref<1x112x256xbf16, #tpu.memory_space<vmem>>, %arg3: memref<32x112xbf16, #tpu.memory_space<vmem>>, %arg4: memref<1x8x256xf32, #tpu.memory_space<vmem>>, %arg5: memref<1x8x256xf32, #tpu.memory_space<vmem>>, %arg6: memref<1x8x256xf32, #tpu.memory_space<vmem>>) attributes {dimension_semantics = [#tpu.dimension_semantics<parallel>, #tpu.dimension_semantics<parallel>], iteration_bounds = array<i64: 2, 1>, scalar_prefetch = 0 : i64, scratch_operands = 0 : i64, tpu.core_type = #tpu.core_type<tc>, window_params = [{transform_indices = @transform_0, window_bounds = array<i64: 1, 112, 256>}, {pipeline_mode = #tpu.pipeline_mode<synchronous>, transform_indices = @transform_1, window_bounds = array<i64: 32, 112>}, {transform_indices = @transform_2, window_bounds = array<i64: 1, 8, 256>}, {transform_indices = @transform_3, window_bounds = array<i64: 1, 8, 256>}, {transform_indices = @transform_4, window_bounds = array<i64: 1, 8, 256>}]} {
    %c0 = arith.constant 0 : index
    %c0_0 = arith.constant 0 : index
    %0 = vector.load %arg3[%c0, %c0_0] : memref<32x112xbf16, #tpu.memory_space<vmem>>, vector<32x112xbf16>
    %c0_1 = arith.constant 0 : index
    %c0_2 = arith.constant 0 : index
    %c0_3 = arith.constant 0 : index
    %1 = vector.load %arg2[%c0_1, %c0_2, %c0_3] : memref<1x112x256xbf16, #tpu.memory_space<vmem>>, vector<1x112x256xbf16>
    %2 = vector.shape_cast %1 : vector<1x112x256xbf16> to vector<112x256xbf16>
    %cst = arith.constant dense<0.000000e+00> : vector<32x256xf32>
    %3 = tpu.matmul %0, %2, %cst {dimension_numbers = #tpu.dot_dimension_numbers<[1], [0], [0], [1], [0, 0, 1, 1], [], []>} : vector<32x112xbf16>, vector<112x256xbf16>, vector<32x256xf32> -> vector<32x256xf32>
    %4 = vector.extract_strided_slice %3 {offsets = [0, 0], sizes = [24, 256], strides = [1, 1]} : vector<32x256xf32> to vector<24x256xf32>
    %cst_4 = arith.constant 5.000000e-01 : f32
    %5 = vector.broadcast %cst_4 : f32 to vector<24x256xf32>
    %6 = arith.mulf %5, %4 : vector<24x256xf32>
    %7 = math.tanh %6 : vector<24x256xf32>
    %cst_5 = arith.constant 5.000000e-01 : f32
    %8 = vector.broadcast %cst_5 : f32 to vector<24x256xf32>
    %9 = arith.mulf %8, %7 : vector<24x256xf32>
    %cst_6 = arith.constant 5.000000e-01 : f32
    %10 = vector.broadcast %cst_6 : f32 to vector<24x256xf32>
    %11 = arith.addf %9, %10 : vector<24x256xf32>
    %12 = vector.extract_strided_slice %3 {offsets = [24, 0], sizes = [8, 256], strides = [1, 1]} : vector<32x256xf32> to vector<8x256xf32>
    %13 = math.tanh %12 : vector<8x256xf32>
    %14 = vector.extract_strided_slice %11 {offsets = [0, 0], sizes = [8, 256], strides = [1, 1]} : vector<24x256xf32> to vector<8x256xf32>
    %15 = vector.extract_strided_slice %11 {offsets = [8, 0], sizes = [8, 256], strides = [1, 1]} : vector<24x256xf32> to vector<8x256xf32>
    %16 = vector.extract_strided_slice %11 {offsets = [16, 0], sizes = [8, 256], strides = [1, 1]} : vector<24x256xf32> to vector<8x256xf32>
    %c0_7 = arith.constant 0 : index
    %c0_8 = arith.constant 0 : index
    %c0_9 = arith.constant 0 : index
    %17 = vector.load %arg4[%c0_7, %c0_8, %c0_9] : memref<1x8x256xf32, #tpu.memory_space<vmem>>, vector<1x8x256xf32>
    %18 = vector.shape_cast %17 : vector<1x8x256xf32> to vector<8x256xf32>
    %19 = arith.mulf %15, %18 : vector<8x256xf32>
    %20 = arith.mulf %14, %13 : vector<8x256xf32>
    %21 = arith.addf %19, %20 : vector<8x256xf32>
    %22 = math.tanh %21 : vector<8x256xf32>
    %23 = arith.mulf %16, %22 : vector<8x256xf32>
    %c0_10 = arith.constant 0 : index
    %c0_11 = arith.constant 0 : index
    %c0_12 = arith.constant 0 : index
    %24 = vector.load %arg5[%c0_10, %c0_11, %c0_12] : memref<1x8x256xf32, #tpu.memory_space<vmem>>, vector<1x8x256xf32>
    %25 = vector.shape_cast %24 : vector<1x8x256xf32> to vector<8x256xf32>
    %26 = vector.shape_cast %23 : vector<8x256xf32> to vector<1x8x256xf32>
    tpu.vector_store %arg5[%c0_10, %c0_11, %c0_12], %26 {strides = array<i32>} : memref<1x8x256xf32, #tpu.memory_space<vmem>>, vector<1x8x256xf32>,
    %c0_13 = arith.constant 0 : index
    %c0_14 = arith.constant 0 : index
    %c0_15 = arith.constant 0 : index
    %27 = vector.load %arg6[%c0_13, %c0_14, %c0_15] : memref<1x8x256xf32, #tpu.memory_space<vmem>>, vector<1x8x256xf32>
    %28 = vector.shape_cast %27 : vector<1x8x256xf32> to vector<8x256xf32>
    %29 = vector.shape_cast %21 : vector<8x256xf32> to vector<1x8x256xf32>
    tpu.vector_store %arg6[%c0_13, %c0_14, %c0_15], %29 {strides = array<i32>} : memref<1x8x256xf32, #tpu.memory_space<vmem>>, vector<1x8x256xf32>,
    return
  }
  func.func @transform_0(%arg0: i32, %arg1: i32) -> (i32, i32, i32) {
    %c0_i32 = arith.constant 0 : i32
    %c0_i32_0 = arith.constant 0 : i32
    return %arg0, %c0_i32, %arg1 : i32, i32, i32
  }
  func.func @transform_1(%arg0: i32, %arg1: i32) -> (i32, i32) {
    %c0_i32 = arith.constant 0 : i32
    %c0_i32_0 = arith.constant 0 : i32
    %c0_i32_1 = arith.constant 0 : i32
    return %c0_i32, %c0_i32_0 : i32, i32
  }
  func.func @transform_2(%arg0: i32, %arg1: i32) -> (i32, i32, i32) {
    %c0_i32 = arith.constant 0 : i32
    %c0_i32_0 = arith.constant 0 : i32
    return %arg0, %c0_i32, %arg1 : i32, i32, i32
  }
  func.func @transform_3(%arg0: i32, %arg1: i32) -> (i32, i32, i32) {
    %c0_i32 = arith.constant 0 : i32
    %c0_i32_0 = arith.constant 0 : i32
    return %arg0, %c0_i32, %arg1 : i32, i32, i32
  }
  func.func @transform_4(%arg0: i32, %arg1: i32) -> (i32, i32, i32) {
    %c0_i32 = arith.constant 0 : i32
    %c0_i32_0 = arith.constant 0 : i32
    return %arg0, %c0_i32, %arg1 : i32, i32, i32
  }
}

</mosaic_0001>

<bundles_post_ra>
// kernel: conv_lstm2d_cell.1
= control target key start
LH: loop header
LB: loop body
LE: loop exit
PB: predicated region body
PF: predicated region fallthrough
CT: control target
= control target key end

     0   :  { %s821_s15 = smov 0   ;;  %s823_s16 = smov 0   ;;  %s891_s0 = inlined_call_operand.vmem [shape: bf16[2,112,256], index: 0, kind: input, shape index: {}]   ;;  %s892_s1 = inlined_call_operand.vmem [shape: bf16[32,112], index: 1, kind: input, shape index: {}]   ;;  %s893_s2 = inlined_call_operand.vmem [shape: f32[2,8,256], index: 2, kind: input, shape index: {}, may-alias: {2,4}]   ;;  %s894_s3 = inlined_call_operand.vmem [shape: f32[2,8,256], index: 3, kind: output, shape index: {0}]   ;;  %s895_s4 = inlined_call_operand.vmem [shape: f32[2,8,256], index: 4, kind: output, shape index: {1}, may-alias: {2,4}]  }
   0x1   :  { %s825_s17 = smov 0  }
   0x2 LB: > { %s27_s18 = sadd.s32 1, %s789_s16  ;;  %p657_p0 = scmp.ge.s32.totalorder %s793_s17, 1  ;;  %s793_s17 = sphi %s825_s17, %s15_s17   ;;  %s789_s16 = sphi %s823_s16, %s897_s16   ;;  %s785_s15 = sphi %s821_s15, %s896_s15  }
   0x3   : > { %p29_p1 = scmp.ge.s32.totalorder %s27_s18, 2  ;;  %p205_p2 = scmp.lt.s32.totalorder %s793_s17, 3 }
   0x5   : > { %s899_s18 = smov (%p29_p1, %s27_s18), 0  ;;  %p206_p3 = pnand %p657_p0, %p205_p2 }
   0x6   : > { %p258_p4 = scmp.lt.s32.totalorder (!%p206_p3), %s785_s15, 1  ;;  %v795_v0 = vmov (!%p206_p3), 0   ;;  %v749_v15 = vld [vmem:[%s892_s1] sm:$0xff] (!%p206_p3)   ;;  %v750_v16 = vld [vmem:[%s892_s1 + $0x8] sm:$0xff] (!%p206_p3)   ;;  %vm396_vm0 = vcmask (!%p206_p3), 916480  }
   0x7   : > { %209 = sbr.rel (%p206_p3) target bundleno = 297 (0x129), region = 32  ;;  %435 = vmatprep.mubr.bf16.mxu0 (!%p206_p3), %v795_v0  ;;  %445 = vmatprep.mubr.bf16.mxu1 (!%p206_p3), %v795_v0 }
   0xe   : > { %s901_s15 = smov (!%p258_p4, %s785_s15), 1 }
   0xf   : > { %s702_s19 = smul.u32 112, %s901_s15  ;;  %s868_s27 = sshll.u32 %s901_s15, 4 }
  0x10   : > { %s275_s30 = scalar_lea.vmem %s893_s2, %s868_s27  ;;  %s295_s7 = scalar_lea.vmem %s895_s4, %s868_s27 }
  0x11   : > { %s845_s22 = scalar_lea.vmem %s891_s0, %s702_s19  ;;  %v482_v40 = vld [vmem:[%s275_s30] sm:$0xff]  ;;  %v483_v43 = vld [vmem:[%s275_s30 + $0x8] sm:$0xff]  ;;  %s285_s10 = scalar_lea.vmem %s894_s3, %s868_s27 }
  0x12   : > { %v728_v1 = vld [vmem:[%s845_s22 + $0x4] ss:$8 sps:$4 sm:$0xff]   ;;  %v730_v2 = vld [vmem:[%s845_s22] ss:$8 sps:$4 sm:$0xff]   ;;  %v731_v3 = vld [vmem:[%s845_s22 + $0x14] ss:$8 sps:$4 sm:$0xff]  }
  0x13   : > { %403 = vmatprep.subr.bf16.mxu0 %v728_v1  ;;  %688 = vmatprep.subr.bf16.mxu1 %v728_v1  ;;  %v733_v4 = vld [vmem:[%s845_s22 + $0x10] ss:$8 sps:$4 sm:$0xff]   ;;  %v734_v5 = vld [vmem:[%s845_s22 + $0x24] ss:$8 sps:$4 sm:$0xff]   ;;  %v736_v6 = vld [vmem:[%s845_s22 + $0x20] ss:$8 sps:$4 sm:$0xff]  }
  0x14   : > { %404 = vmatpush1.bf16.msra.mxu0 %v730_v2  ;;  %695 = vmatpush1.bf16.msra.mxu1 %v730_v2  ;;  %v737_v7 = vld [vmem:[%s845_s22 + $0x34] ss:$8 sps:$4 sm:$0xff]   ;;  %v739_v8 = vld [vmem:[%s845_s22 + $0x30] ss:$8 sps:$4 sm:$0xff]   ;;  %v740_v9 = vld [vmem:[%s845_s22 + $0x44] ss:$8 sps:$4 sm:$0xff]  }
  0x15   : > { %405 = vmatprep.subr.bf16.mxu0 %v731_v3  ;;  %689 = vmatprep.subr.bf16.mxu1 %v731_v3  ;;  %v742_v10 = vld [vmem:[%s845_s22 + $0x40] ss:$8 sps:$4 sm:$0xff]   ;;  %v743_v11 = vld [vmem:[%s845_s22 + $0x54] ss:$8 sps:$4 sm:$0xff]   ;;  %v745_v12 = vld [vmem:[%s845_s22 + $0x50] ss:$8 sps:$4 sm:$0xff]  }
  0x16   : > { %v746_v13 = vld [vmem:[%s845_s22 + $0x64] ss:$8 sps:$4 sm:$0xff]   ;;  %v748_v14 = vld [vmem:[%s845_s22 + $0x60] ss:$8 sps:$4 sm:$0xff]  }
  0x18   : > { %406 = vmatpush1.bf16.msra.mxu0 %v733_v4  ;;  %696 = vmatpush1.bf16.msra.mxu1 %v733_v4 }
  0x19   : > { %407 = vmatprep.subr.bf16.mxu0 %v734_v5  ;;  %690 = vmatprep.subr.bf16.mxu1 %v734_v5 }
  0x1c   : > { %408 = vmatpush1.bf16.msra.mxu0 %v736_v6  ;;  %697 = vmatpush1.bf16.msra.mxu1 %v736_v6 }
  0x1d   : > { %409 = vmatprep.subr.bf16.mxu0 %v737_v7  ;;  %691 = vmatprep.subr.bf16.mxu1 %v737_v7 }
  0x20   : > { %410 = vmatpush1.bf16.msra.mxu0 %v739_v8  ;;  %698 = vmatpush1.bf16.msra.mxu1 %v739_v8 }
  0x21   : > { %411 = vmatprep.subr.bf16.mxu0 %v740_v9  ;;  %692 = vmatprep.subr.bf16.mxu1 %v740_v9 }
  0x24   : > { %412 = vmatpush1.bf16.msra.mxu0 %v742_v10  ;;  %699 = vmatpush1.bf16.msra.mxu1 %v742_v10 }
  0x25   : > { %413 = vmatprep.subr.bf16.mxu0 %v743_v11  ;;  %693 = vmatprep.subr.bf16.mxu1 %v743_v11 }
  0x28   : > { %414 = vmatpush1.bf16.msra.mxu0 %v745_v12  ;;  %700 = vmatpush1.bf16.msra.mxu1 %v745_v12 }
  0x29   : > { %415 = vmatprep.subr.bf16.mxu0 %v746_v13  ;;  %694 = vmatprep.subr.bf16.mxu1 %v746_v13 }
  0x2c   : > { %416 = vmatpush1.bf16.msra.mxu0 %v748_v14  ;;  %701 = vmatpush1.bf16.msra.mxu1 %v748_v14 }
  0x2f   : > { %681 = vmatmul.mubr.msk.bf16.vlgmr.msra.gmra.mrb[0].mxu0 %vm396_vm0, %v749_v15  ;;  %682 = vmatmul.mubr.msk.bf16.vlgmr.msra.gmra.mrb[0].mxu1 %vm396_vm0, %v750_v16 }
 0x102   : > { %v437_v17 = vpop.f32.mrb[0].mxu0  ;;  %v447_v18 = vpop.f32.mrb[0].mxu1 }
 0x103   : > { %v456_v19 = vmul.f32 0.5, %v437_v17  ;;  %v439_v20 = vpop.f32.mrb[1].mxu0  ;;  %v449_v21 = vpop.f32.mrb[1].mxu1  ;;  %v460_v29 = vmul.f32 0.5, %v447_v18 }
 0x104   : > { %v457_v22 = vmul.f32 0.5, %v439_v20  ;;  %v441_v23 = vpop.f32.mrb[2].mxu0  ;;  %v451_v24 = vpop.f32.mrb[2].mxu1  ;;  %v461_v31 = vmul.f32 0.5, %v449_v21 }
 0x105   : > { %751 = vtanh.f32 %v456_v19  ;;  %v458_v25 = vmul.f32 0.5, %v441_v23  ;;  %v443_v26 = vpop.f32.mrb[3].mxu0  ;;  %v453_v27 = vpop.f32.mrb[3].mxu1 }
 0x106   : > { %753 = vtanh.f32 %v457_v22  ;;  %v459_v28 = vmul.f32 0.5, %v443_v26 }
 0x107   : > { %755 = vtanh.f32 %v458_v25 }
 0x108   : > { %757 = vtanh.f32 %v459_v28 }
 0x109   : > { %759 = vtanh.f32 %v451_v24 }
 0x10a   : > { %761 = vtanh.f32 %v453_v27 }
 0x10b   : > { %763 = vtanh.f32 %v460_v29 }
 0x10c   : > { %765 = vtanh.f32 %v461_v31 }
 0x10f   : > { %v752_v30 = vpop.eup %751 }
 0x110   : > { %v754_v32 = vpop.eup %753  ;;  %v468_v33 = vmul.f32 0.5, %v752_v30 }
 0x111   : > { %v756_v34 = vpop.eup %755  ;;  %v469_v35 = vmul.f32 0.5, %v754_v32 }
 0x112   : > { %v758_v36 = vpop.eup %757  ;;  %v474_v37 = vadd.f32 0.5, %v468_v33  ;;  %v470_v38 = vmul.f32 0.5, %v756_v34 }
 0x113   : > { %v475_v39 = vadd.f32 0.5, %v469_v35  ;;  %v471_v41 = vmul.f32 0.5, %v758_v36  ;;  %v760_v44 = vpop.eup %759 }
 0x114   : > { %v476_v42 = vadd.f32 0.5, %v470_v38  ;;  %v762_v46 = vpop.eup %761  ;;  %v486_v48 = vmul.f32 %v760_v44, %v474_v37 }
 0x115   : > { %v477_v45 = vadd.f32 0.5, %v471_v41  ;;  %v487_v50 = vmul.f32 %v762_v46, %v475_v39  ;;  %v764_v53 = vpop.eup %763 }
 0x116   : > { %v484_v47 = vmul.f32 %v482_v40, %v476_v42  ;;  %v766_v54 = vpop.eup %765  ;;  %v472_v55 = vmul.f32 0.5, %v764_v53 }
 0x117   : > { %v485_v49 = vmul.f32 %v483_v43, %v477_v45  ;;  %v473_v56 = vmul.f32 0.5, %v766_v54 }
 0x118   : > { %v488_v51 = vadd.f32 %v486_v48, %v484_v47  ;;  %v478_v57 = vadd.f32 0.5, %v472_v55 }
 0x119   : > { %v489_v52 = vadd.f32 %v487_v50, %v485_v49  ;;  %v479_v59 = vadd.f32 0.5, %v473_v56 }
 0x11a   : > { %767 = vtanh.f32 %v488_v51  ;;  %496 = vst [vmem:[%s295_s7] sm:$0xff] %v488_v51 }
 0x11b   : > { %769 = vtanh.f32 %v489_v52  ;;  %497 = vst [vmem:[%s295_s7 + $0x8] sm:$0xff] %v489_v52 }
 0x124   : > { %v768_v58 = vpop.eup %767 }
 0x125   : > { %v770_v60 = vpop.eup %769  ;;  %v492_v61 = vmul.f32 %v768_v58, %v478_v57 }
 0x126   : > { %v493_v62 = vmul.f32 %v770_v60, %v479_v59 }
 0x127   : > { %494 = vst [vmem:[%s285_s10] sm:$0xff] %v492_v61 }
 0x128   : > { %495 = vst [vmem:[%s285_s10 + $0x8] sm:$0xff] %v493_v62 }
 0x129 PF: > { %s15_s17 = sadd.s32 1, %s793_s17   ;;  %s896_s15 = smov %s789_s16 }
 0x12a   : > { %p12_p5 = scmp.ge.s32.totalorder %s15_s17, 4   ;;  %s897_s16 = smov %s899_s18 }
 0x12c   :  { %14 = sbr.rel (!%p12_p5) target bundleno = 2 (0x2), region = 77 }

</bundles_post_ra>
